<compile_context>
chip_gen: v7x
topology: tpu7x:2x2x1
jax: 0.10.0
libtpu: 0.0.40
codegen_flags: <defaults>
</compile_context>

<pallas_src>
import functools
import math

import jax
import jax.numpy as jnp
from jax import lax
from jax.experimental import pallas as pl
from jax.experimental.pallas import tpu as pltpu


# --------------------------------------------------------------------------
# Fused kernel (one grid step == Nb images)
# --------------------------------------------------------------------------
def _ghost_fused_kernel(x_ref, par_ref, place_ref, mask_ref, o_ref, *,
                        nb, cin, cinit, h, w):
    # x_ref:     (Nb*Cin, HW)            Nb images, channels on sublanes
    # par_ref:   (Nb*Cinit, Nb*Cin+11)   [kron(I,W1) | dw taps(9) | b1 | b2]
    # place_ref: (Nb*2*Cinit, 2*Nb*Cinit)  [P1 | P2] 0/1 placement matrices
    # mask_ref:  (4, HW)                 [col>=1, col<=W-2, row>=1, row<=H-2]
    # o_ref:     (Nb*2*Cinit, HW)        interleaved per-image [primary;cheap]
    hw = h * w
    cg = nb * cinit
    kc = nb * cin

    x = x_ref[...]                                              # (Nb*Cin, HW)

    w1k  = par_ref[:, :kc]                                      # (CG, Nb*Cin)
    taps = par_ref[:, kc:kc + 9]                                # (CG, 9)
    b1   = par_ref[:, kc + 9:kc + 10]                           # (CG, 1)
    b2   = par_ref[:, kc + 10:kc + 11]                          # (CG, 1)

    # ---- primary 1x1 conv (+ folded BN) + ReLU: ONE MXU matmul per step ----
    y1 = jnp.dot(w1k, x, preferred_element_type=jnp.float32)    # (CG, HW)
    y1 = jnp.maximum(y1 + b1, 0.0)

    # ---- cheap depthwise 3x3 (+ folded BN) + ReLU, factored stencil --------
    col_m = mask_ref[0:1, :]          # valid for dx = -1
    col_p = mask_ref[1:2, :]          # valid for dx = +1
    row_m = mask_ref[2:3, :]          # valid for dy = -1
    row_p = mask_ref[3:4, :]          # valid for dy = +1

    # Column pass: rolls are circular along the per-image HW lane axis;
    # every wrap / out-of-image position is zeroed by the masks.
    c_m = col_m * pltpu.roll(y1, 1, axis=1)                     # y1[p - 1]
    c_0 = y1
    c_p = col_p * pltpu.roll(y1, hw - 1, axis=1)                # y1[p + 1]

    t = lambda k: taps[:, k:k + 1]                              # (CG, 1) tap
    p_m = t(0) * c_m + t(1) * c_0 + t(2) * c_p                  # dy = -1 taps
    p_0 = t(3) * c_m + t(4) * c_0 + t(5) * c_p                  # dy =  0 taps
    p_p = t(6) * c_m + t(7) * c_0 + t(8) * c_p                  # dy = +1 taps

    # Row pass (column masks commute with the +-W shift inside valid rows).
    acc = (p_0
           + row_m * pltpu.roll(p_m, w, axis=1)                 # partial[p-W]
           + row_p * pltpu.roll(p_p, hw - w, axis=1))           # partial[p+W]
    y2 = jnp.maximum(acc + b2, 0.0)                             # (CG, HW)

    # ---- interleave per-image [primary; cheap] rows and store ONCE ---------
    # Constant 0/1 placement matmuls are bit-exact and avoid sub-8-sublane
    # masked stores / unsupported sublane reshapes.
    p1 = place_ref[:, :cg]
    p2 = place_ref[:, cg:]
    out = (jnp.dot(p1, y1, preferred_element_type=jnp.float32)
           + jnp.dot(p2, y2, preferred_element_type=jnp.float32))
    o_ref[...] = out                                            # full tile


# --------------------------------------------------------------------------
# Batch-block size chooser (Nb images per grid step)
# --------------------------------------------------------------------------
def _choose_nb(n, cin, cout2, hw):
    # Keep per-step blocks small enough for v7x (64 MiB physical / 32 MiB
    # scoped VMEM default) even with double buffering + intermediates, keep
    # the grid length >= 2 so v7x's two TensorCores both get work, and keep
    # the block sublane-aligned (multiple of 8 rows) for unmasked stores.
    budget = 2 * 1024 * 1024                       # bytes per in+out block
    per_img = (cin + cout2) * hw * 4
    cands = [nb for nb in range(1, n + 1)
             if n % nb == 0
             and (n < 2 or n // nb >= 2)
             and (nb * cin) % 8 == 0 and (nb * cout2) % 8 == 0
             and nb * per_img <= budget]
    return max(cands) if cands else n              # nb == n is always legal


# --------------------------------------------------------------------------
# Wrapper
# --------------------------------------------------------------------------
def ghost_module_forward(x, params, oup):
    """x: (N, Cin, H, W) f32 -> (N, oup, H, W) f32 (GhostModule forward)."""
    N, Cin, H, W = x.shape
    w1, s1, b1 = params["w1"], params["scale1"], params["bias1"]   # 1x1 conv
    w2, s2, b2 = params["w2"], params["scale2"], params["bias2"]   # dw 3x3
    Cinit = w1.shape[0]
    Cnew = w2.shape[0]
    # TODO(synk): fused path assumes ratio=2 (new_channels == init_channels);
    # ratio>2 needs per-input-channel output replication in the cheap stage.
    assert Cnew == Cinit, "fused GhostModule kernel supports ratio=2 only"
    HW = H * W
    Cout2 = 2 * Cinit
    f32 = jnp.float32

    # Fold eval-mode BatchNorm scales into the conv weights (host side, free).
    w1f = (s1[:, None] * w1).astype(f32)                         # (Cinit, Cin)
    w2f = (s2[:, None, None] * w2).reshape(Cinit, 9).astype(f32)
    b1c = b1.reshape(Cinit, 1).astype(f32)
    b2c = b2.reshape(Cinit, 1).astype(f32)

    # ---- batching: Nb images per grid step ---------------------------------
    Nb = _choose_nb(N, Cin, Cout2, HW)
    grid = N // Nb
    CG = Nb * Cinit
    KC = Nb * Cin

    # Block-diagonal primary weight: one matmul contracts all Nb images.
    w1_blk = jnp.kron(jnp.eye(Nb, dtype=f32), w1f)               # (CG, KC)
    taps_t = jnp.tile(w2f, (Nb, 1))                              # (CG, 9)
    b1_t = jnp.tile(b1c, (Nb, 1))                                # (CG, 1)
    b2_t = jnp.tile(b2c, (Nb, 1))                                # (CG, 1)
    packed = jnp.concatenate([w1_blk, taps_t, b1_t, b2_t], axis=1)

    # Placement matrices: scatter compact halves into interleaved rows.
    rows1 = (jnp.arange(Nb)[:, None] * Cout2
             + jnp.arange(Cinit)[None, :]).reshape(-1)           # primary rows
    rows2 = rows1 + Cinit                                        # cheap rows
    colsf = (jnp.arange(Nb)[:, None] * Cinit
             + jnp.arange(Cinit)[None, :]).reshape(-1)
    P1 = jnp.zeros((Nb * Cout2, CG), f32).at[rows1, colsf].set(1.0)
    P2 = jnp.zeros((Nb * Cout2, CG), f32).at[rows2, colsf].set(1.0)
    placer = jnp.concatenate([P1, P2], axis=1)                   # (2CG, 2CG)

    # Halo masks, precomputed once (resident across grid steps).
    lane = jnp.arange(HW, dtype=jnp.int32)
    r = lane // W
    c = lane % W
    masks = jnp.stack([(c >= 1), (c <= W - 2), (r >= 1), (r <= H - 2)],
                      axis=0).astype(f32)                        # (4, HW)

    x2d = x.reshape(N * Cin, HW)                                 # free reshape

    out2d = pl.pallas_call(
        functools.partial(_ghost_fused_kernel, nb=Nb, cin=Cin, cinit=Cinit,
                          h=H, w=W),
        out_shape=jax.ShapeDtypeStruct((N * Cout2, HW), f32),
        grid_spec=pltpu.PrefetchScalarGridSpec(
            num_scalar_prefetch=0,
            grid=(grid,),
            in_specs=[
                pl.BlockSpec((Nb * Cin, HW), lambda i: (i, 0)),
                pl.BlockSpec((CG, KC + 11), lambda i: (0, 0)),
                pl.BlockSpec((Nb * Cout2, 2 * CG), lambda i: (0, 0)),
                pl.BlockSpec((4, HW), lambda i: (0, 0)),
            ],
            out_specs=pl.BlockSpec((Nb * Cout2, HW), lambda i: (i, 0)),
        ),
        compiler_params=pltpu.CompilerParams(
            dimension_semantics=("parallel",)),
    )(x2d, packed, placer, masks)

    out = out2d.reshape(N, Cout2, H, W)
    if oup != Cout2:
        # TODO(synk): for odd oup prefer slicing lazily in the consumer --
        # materializing the slice here adds an extra HBM round trip.
        out = out[:, :oup, :, :]
    return out


# --------------------------------------------------------------------------
# Pure-JAX reference (correctness check only)
# --------------------------------------------------------------------------
def ghost_module_reference(x, params, oup):
    w1, s1, b1 = params["w1"], params["scale1"], params["bias1"]
    w2, s2, b2 = params["w2"], params["scale2"], params["bias2"]
    Cinit = w1.shape[0]
    dn = ("NCHW", "OIHW", "NCHW")

    y1 = lax.conv_general_dilated(
        x, w1[:, :, None, None], (1, 1), "VALID", dimension_numbers=dn)
    y1 = jnp.maximum(y1 * s1[None, :, None, None] + b1[None, :, None, None], 0.0)

    y2 = lax.conv_general_dilated(
        y1, w2[:, None, :, :], (1, 1), ((1, 1), (1, 1)),
        dimension_numbers=dn, feature_group_count=Cinit)
    y2 = jnp.maximum(y2 * s2[None, :, None, None] + b2[None, :, None, None], 0.0)

    return jnp.concatenate([y1, y2], axis=1)[:, :oup, :, :]


# --------------------------------------------------------------------------
# Main
# --------------------------------------------------------------------------
if __name__ == "__main__":
    # GhostModule defaults: kernel_size=1, ratio=2, dw_size=3, stride=1, relu.
    inp, oup, ratio = 4, 8, 2
    init_channels = math.ceil(oup / ratio)              # 4
    new_channels = init_channels * (ratio - 1)           # 4
    N, H, W = 8, 16, 16                                   # N=8 -> Nb=4, grid=2
    eps = 1e-5

    key = jax.random.PRNGKey(0)
    kx, kw1, kw2 = jax.random.split(key, 3)

    x = jax.random.normal(kx, (N, inp, H, W), jnp.float32)

    # Conv weights (bias=False as in the module).
    w1 = jax.random.normal(kw1, (init_channels, inp), jnp.float32) * 0.2
    w2 = jax.random.normal(kw2, (init_channels, 3, 3), jnp.float32) * 0.2

    # Eval-mode BatchNorm folded into scale/bias.
    gamma1 = 1.0 + 0.1 * jnp.arange(init_channels, dtype=jnp.float32)
    beta1 = 0.05 * jnp.arange(init_channels, dtype=jnp.float32)
    mean1 = jnp.zeros((init_channels,), jnp.float32)
    var1 = jnp.ones((init_channels,), jnp.float32)
    scale1 = gamma1 / jnp.sqrt(var1 + eps)
    bias1 = beta1 - mean1 * scale1

    gamma2 = 1.0 - 0.05 * jnp.arange(new_channels, dtype=jnp.float32)
    beta2 = 0.02 * jnp.arange(new_channels, dtype=jnp.float32)
    mean2 = jnp.zeros((new_channels,), jnp.float32)
    var2 = jnp.ones((new_channels,), jnp.float32)
    scale2 = gamma2 / jnp.sqrt(var2 + eps)
    bias2 = beta2 - mean2 * scale2

    params = dict(w1=w1, scale1=scale1, bias1=bias1,
                  w2=w2, scale2=scale2, bias2=bias2)

    out = jax.jit(lambda x: ghost_module_forward(x, params, oup))(x)
    out = jax.block_until_ready(out)

    ref = ghost_module_reference(x, params, oup)
    assert out.shape == (N, oup, H, W), out.shape
    assert jnp.allclose(out, ref, atol=1e-4, rtol=1e-4), \
        f"max abs err {jnp.max(jnp.abs(out - ref))}"

    print("KERNEL_OK")
</pallas_src>

<mosaic_0001>
module attributes {stable_mosaic.version = 11 : i64} {
  func.func @_ghost_fused_kernel(%arg0: i32, %arg1: memref<16x256xf32, #tpu.memory_space<vmem>>, %arg2: memref<16x27xf32, #tpu.memory_space<vmem>>, %arg3: memref<32x32xf32, #tpu.memory_space<vmem>>, %arg4: memref<4x256xf32, #tpu.memory_space<vmem>>, %arg5: memref<32x256xf32, #tpu.memory_space<vmem>>) attributes {dimension_semantics = [#tpu.dimension_semantics<parallel>], iteration_bounds = array<i64: 2>, scalar_prefetch = 0 : i64, scratch_operands = 0 : i64, tpu.core_type = #tpu.core_type<tc>, window_params = [{transform_indices = @transform_0, window_bounds = array<i64: 16, 256>}, {pipeline_mode = #tpu.pipeline_mode<synchronous>, transform_indices = @transform_1, window_bounds = array<i64: 16, 27>}, {pipeline_mode = #tpu.pipeline_mode<synchronous>, transform_indices = @transform_2, window_bounds = array<i64: 32, 32>}, {pipeline_mode = #tpu.pipeline_mode<synchronous>, transform_indices = @transform_3, window_bounds = array<i64: 4, 256>}, {transform_indices = @transform_4, window_bounds = array<i64: 32, 256>}]} {
    %c0 = arith.constant 0 : index
    %c0_0 = arith.constant 0 : index
    %0 = vector.load %arg1[%c0, %c0_0] : memref<16x256xf32, #tpu.memory_space<vmem>>, vector<16x256xf32>
    %c0_1 = arith.constant 0 : index
    %c0_2 = arith.constant 0 : index
    %1 = vector.load %arg2[%c0_1, %c0_2] : memref<16x27xf32, #tpu.memory_space<vmem>>, vector<16x16xf32>
    %c0_3 = arith.constant 0 : index
    %c16 = arith.constant 16 : index
    %2 = vector.load %arg2[%c0_3, %c16] : memref<16x27xf32, #tpu.memory_space<vmem>>, vector<16x9xf32>
    %c0_4 = arith.constant 0 : index
    %c25 = arith.constant 25 : index
    %3 = vector.load %arg2[%c0_4, %c25] : memref<16x27xf32, #tpu.memory_space<vmem>>, vector<16x1xf32>
    %c0_5 = arith.constant 0 : index
    %c26 = arith.constant 26 : index
    %4 = vector.load %arg2[%c0_5, %c26] : memref<16x27xf32, #tpu.memory_space<vmem>>, vector<16x1xf32>
    %cst = arith.constant dense<0.000000e+00> : vector<16x256xf32>
    %5 = tpu.matmul %1, %0, %cst {dimension_numbers = #tpu.dot_dimension_numbers<[1], [0], [0], [1], [0, 0, 1, 1], [], []>} : vector<16x16xf32>, vector<16x256xf32>, vector<16x256xf32> -> vector<16x256xf32>
    %6 = vector.broadcast %3 : vector<16x1xf32> to vector<16x256xf32>
    %7 = arith.addf %5, %6 : vector<16x256xf32>
    %cst_6 = arith.constant 0.000000e+00 : f32
    %8 = vector.broadcast %cst_6 : f32 to vector<16x256xf32>
    %9 = arith.maximumf %7, %8 : vector<16x256xf32>
    %c0_7 = arith.constant 0 : index
    %c0_8 = arith.constant 0 : index
    %10 = vector.load %arg4[%c0_7, %c0_8] : memref<4x256xf32, #tpu.memory_space<vmem>>, vector<1x256xf32>
    %c1 = arith.constant 1 : index
    %c0_9 = arith.constant 0 : index
    %11 = vector.load %arg4[%c1, %c0_9] : memref<4x256xf32, #tpu.memory_space<vmem>>, vector<1x256xf32>
    %c2 = arith.constant 2 : index
    %c0_10 = arith.constant 0 : index
    %12 = vector.load %arg4[%c2, %c0_10] : memref<4x256xf32, #tpu.memory_space<vmem>>, vector<1x256xf32>
    %c3 = arith.constant 3 : index
    %c0_11 = arith.constant 0 : index
    %13 = vector.load %arg4[%c3, %c0_11] : memref<4x256xf32, #tpu.memory_space<vmem>>, vector<1x256xf32>
    %c1_i32 = arith.constant 1 : i32
    %14 = tpu.dynamic_rotate %9 by %c1_i32 dim 1 : vector<16x256xf32>, i32 -> vector<16x256xf32>
    %15 = vector.broadcast %10 : vector<1x256xf32> to vector<16x256xf32>
    %16 = arith.mulf %15, %14 : vector<16x256xf32>
    %c255_i32 = arith.constant 255 : i32
    %17 = tpu.dynamic_rotate %9 by %c255_i32 dim 1 : vector<16x256xf32>, i32 -> vector<16x256xf32>
    %18 = vector.broadcast %11 : vector<1x256xf32> to vector<16x256xf32>
    %19 = arith.mulf %18, %17 : vector<16x256xf32>
    %20 = vector.extract_strided_slice %2 {offsets = [0, 0], sizes = [16, 1], strides = [1, 1]} : vector<16x9xf32> to vector<16x1xf32>
    %21 = vector.broadcast %20 : vector<16x1xf32> to vector<16x256xf32>
    %22 = arith.mulf %21, %16 : vector<16x256xf32>
    %23 = vector.extract_strided_slice %2 {offsets = [0, 1], sizes = [16, 1], strides = [1, 1]} : vector<16x9xf32> to vector<16x1xf32>
    %24 = vector.broadcast %23 : vector<16x1xf32> to vector<16x256xf32>
    %25 = arith.mulf %24, %9 : vector<16x256xf32>
    %26 = arith.addf %22, %25 : vector<16x256xf32>
    %27 = vector.extract_strided_slice %2 {offsets = [0, 2], sizes = [16, 1], strides = [1, 1]} : vector<16x9xf32> to vector<16x1xf32>
    %28 = vector.broadcast %27 : vector<16x1xf32> to vector<16x256xf32>
    %29 = arith.mulf %28, %19 : vector<16x256xf32>
    %30 = arith.addf %26, %29 : vector<16x256xf32>
    %31 = vector.extract_strided_slice %2 {offsets = [0, 3], sizes = [16, 1], strides = [1, 1]} : vector<16x9xf32> to vector<16x1xf32>
    %32 = vector.broadcast %31 : vector<16x1xf32> to vector<16x256xf32>
    %33 = arith.mulf %32, %16 : vector<16x256xf32>
    %34 = vector.extract_strided_slice %2 {offsets = [0, 4], sizes = [16, 1], strides = [1, 1]} : vector<16x9xf32> to vector<16x1xf32>
    %35 = vector.broadcast %34 : vector<16x1xf32> to vector<16x256xf32>
    %36 = arith.mulf %35, %9 : vector<16x256xf32>
    %37 = arith.addf %33, %36 : vector<16x256xf32>
    %38 = vector.extract_strided_slice %2 {offsets = [0, 5], sizes = [16, 1], strides = [1, 1]} : vector<16x9xf32> to vector<16x1xf32>
    %39 = vector.broadcast %38 : vector<16x1xf32> to vector<16x256xf32>
    %40 = arith.mulf %39, %19 : vector<16x256xf32>
    %41 = arith.addf %37, %40 : vector<16x256xf32>
    %42 = vector.extract_strided_slice %2 {offsets = [0, 6], sizes = [16, 1], strides = [1, 1]} : vector<16x9xf32> to vector<16x1xf32>
    %43 = vector.broadcast %42 : vector<16x1xf32> to vector<16x256xf32>
    %44 = arith.mulf %43, %16 : vector<16x256xf32>
    %45 = vector.extract_strided_slice %2 {offsets = [0, 7], sizes = [16, 1], strides = [1, 1]} : vector<16x9xf32> to vector<16x1xf32>
    %46 = vector.broadcast %45 : vector<16x1xf32> to vector<16x256xf32>
    %47 = arith.mulf %46, %9 : vector<16x256xf32>
    %48 = arith.addf %44, %47 : vector<16x256xf32>
    %49 = vector.extract_strided_slice %2 {offsets = [0, 8], sizes = [16, 1], strides = [1, 1]} : vector<16x9xf32> to vector<16x1xf32>
    %50 = vector.broadcast %49 : vector<16x1xf32> to vector<16x256xf32>
    %51 = arith.mulf %50, %19 : vector<16x256xf32>
    %52 = arith.addf %48, %51 : vector<16x256xf32>
    %c16_i32 = arith.constant 16 : i32
    %53 = tpu.dynamic_rotate %30 by %c16_i32 dim 1 : vector<16x256xf32>, i32 -> vector<16x256xf32>
    %54 = vector.broadcast %12 : vector<1x256xf32> to vector<16x256xf32>
    %55 = arith.mulf %54, %53 : vector<16x256xf32>
    %56 = arith.addf %41, %55 : vector<16x256xf32>
    %c240_i32 = arith.constant 240 : i32
    %57 = tpu.dynamic_rotate %52 by %c240_i32 dim 1 : vector<16x256xf32>, i32 -> vector<16x256xf32>
    %58 = vector.broadcast %13 : vector<1x256xf32> to vector<16x256xf32>
    %59 = arith.mulf %58, %57 : vector<16x256xf32>
    %60 = arith.addf %56, %59 : vector<16x256xf32>
    %61 = vector.broadcast %4 : vector<16x1xf32> to vector<16x256xf32>
    %62 = arith.addf %60, %61 : vector<16x256xf32>
    %cst_12 = arith.constant 0.000000e+00 : f32
    %63 = vector.broadcast %cst_12 : f32 to vector<16x256xf32>
    %64 = arith.maximumf %62, %63 : vector<16x256xf32>
    %c0_13 = arith.constant 0 : index
    %c0_14 = arith.constant 0 : index
    %65 = vector.load %arg3[%c0_13, %c0_14] : memref<32x32xf32, #tpu.memory_space<vmem>>, vector<32x16xf32>
    %c0_15 = arith.constant 0 : index
    %c16_16 = arith.constant 16 : index
    %66 = vector.load %arg3[%c0_15, %c16_16] : memref<32x32xf32, #tpu.memory_space<vmem>>, vector<32x16xf32>
    %cst_17 = arith.constant dense<0.000000e+00> : vector<32x256xf32>
    %67 = tpu.matmul %65, %9, %cst_17 {dimension_numbers = #tpu.dot_dimension_numbers<[1], [0], [0], [1], [0, 0, 1, 1], [], []>} : vector<32x16xf32>, vector<16x256xf32>, vector<32x256xf32> -> vector<32x256xf32>
    %cst_18 = arith.constant dense<0.000000e+00> : vector<32x256xf32>
    %68 = tpu.matmul %66, %64, %cst_18 {dimension_numbers = #tpu.dot_dimension_numbers<[1], [0], [0], [1], [0, 0, 1, 1], [], []>} : vector<32x16xf32>, vector<16x256xf32>, vector<32x256xf32> -> vector<32x256xf32>
    %69 = arith.addf %67, %68 : vector<32x256xf32>
    %c0_19 = arith.constant 0 : index
    %c0_20 = arith.constant 0 : index
    %70 = vector.load %arg5[%c0_19, %c0_20] : memref<32x256xf32, #tpu.memory_space<vmem>>, vector<32x256xf32>
    tpu.vector_store %arg5[%c0_19, %c0_20], %69 {strides = array<i32>} : memref<32x256xf32, #tpu.memory_space<vmem>>, vector<32x256xf32>,
    return
  }
  func.func @transform_0(%arg0: i32) -> (i32, i32) {
    %c0_i32 = arith.constant 0 : i32
    %c0_i32_0 = arith.constant 0 : i32
    return %arg0, %c0_i32 : i32, i32
  }
  func.func @transform_1(%arg0: i32) -> (i32, i32) {
    %c0_i32 = arith.constant 0 : i32
    %c0_i32_0 = arith.constant 0 : i32
    %c0_i32_1 = arith.constant 0 : i32
    return %c0_i32, %c0_i32_0 : i32, i32
  }
  func.func @transform_2(%arg0: i32) -> (i32, i32) {
    %c0_i32 = arith.constant 0 : i32
    %c0_i32_0 = arith.constant 0 : i32
    %c0_i32_1 = arith.constant 0 : i32
    return %c0_i32, %c0_i32_0 : i32, i32
  }
  func.func @transform_3(%arg0: i32) -> (i32, i32) {
    %c0_i32 = arith.constant 0 : i32
    %c0_i32_0 = arith.constant 0 : i32
    %c0_i32_1 = arith.constant 0 : i32
    return %c0_i32, %c0_i32_0 : i32, i32
  }
  func.func @transform_4(%arg0: i32) -> (i32, i32) {
    %c0_i32 = arith.constant 0 : i32
    %c0_i32_0 = arith.constant 0 : i32
    return %arg0, %c0_i32 : i32, i32
  }
}

</mosaic_0001>

<bundles_post_ra>
// kernel: _lambda_.1
= control target key start
LH: loop header
LB: loop body
LE: loop exit
PB: predicated region body
PF: predicated region fallthrough
CT: control target
= control target key end

     0   :  { %s1002_s15 = smov 0   ;;  %s1259_s0 = inlined_call_operand.vmem [shape: f32[32,256], index: 0, kind: input, shape index: {}]   ;;  %s1260_s1 = inlined_call_operand.vmem [shape: f32[16,27], index: 1, kind: input, shape index: {}]   ;;  %s1261_s2 = inlined_call_operand.vmem [shape: f32[32,32], index: 2, kind: input, shape index: {}]   ;;  %s1262_s3 = inlined_call_operand.vmem [shape: f32[4,256], index: 3, kind: input, shape index: {}]   ;;  %s1263_s4 = inlined_call_operand.vmem [shape: f32[64,256], index: 4, kind: output, shape index: {}]  }
   0x1 LB: > { %s861_s16 = sadd.s32 4294967295, %s959_s15   ;;  %p865_p0 = scmp.ge.s32.totalorder %s959_s15, 1  ;;  %s959_s15 = sphi %s1002_s15, %s14_s15  }
   0x2   : > { %p164_p1 = scmp.lt.s32.totalorder %s959_s15, 3 }
   0x4   : > { %p165_p2 = pnand %p865_p0, %p164_p1 }
   0x5   : > { %s866_s17 = sshll.u32 (!%p165_p2), %s861_s16, 1  ;;  %v961_v0 = vmov (!%p165_p2), 0.0   ;;  %v1016_v1 = vld [vmem:[%s1260_s1] sm:$0xff] (!%p165_p2)  ;;  %v962_v2 = vmov (!%p165_p2), 16   ;;  %v963_v3 = vmov (!%p165_p2), 25   ;;  %v1024_v4 = vld [vmem:[%s1260_s1 + $0x8] sm:$0xff] (!%p165_p2)  ;;  %v323_v45 = vlaneseq (!%p165_p2) }
   0x6   : > { %168 = sbr.rel (%p165_p2) target bundleno = 745 (0x2e9), region = 36  ;;  %p193_p3 = scmp.lt.s32.totalorder (!%p165_p2), %s866_s17, 3  ;;  %291 = vmatprep.mubr.f32.mxu0 (!%p165_p2), %v961_v0  ;;  %936 = vset.pattern.permute.xlu1 (!%p165_p2), %v962_v2  ;;  %v964_v11 = vmov (!%p165_p2), 17   ;;  %vm222_vm0 = vcmask (!%p165_p2), 130048   ;;  %v965_v12 = vmov (!%p165_p2), 18   ;;  %v966_v13 = vmov (!%p165_p2), 22  }
   0x7   : > { %374 = vperm.xlu1 (!%p165_p2), %936, %v1016_v1   ;;  %935 = vset.pattern.permute.xlu0 (!%p165_p2), %v963_v3  ;;  %v967_v14 = vmov (!%p165_p2), 23   ;;  %v968_v15 = vmov (!%p165_p2), 24   ;;  %v969_v16 = vmov (!%p165_p2), 19   ;;  %s970_s26 = smov (!%p165_p2), 1   ;;  %s971_s27 = smov (!%p165_p2), 127   ;;  %v972_v31 = vmov (!%p165_p2), 20  }
   0x8   : > { %214 = vperm.xlu0 (!%p165_p2), %935, %v1016_v1   ;;  %691 = vmatprep.mubr.f32.mxu1 (!%p165_p2), %v961_v0  ;;  %v973_v32 = vmov (!%p165_p2), 26   ;;  %v974_v33 = vmov (!%p165_p2), 21   ;;  %v332_v47 = vshrl.u32 (!%p165_p2), %v323_v45, 7  ;;  %v1089_v49 = vand.u32 (!%p165_p2), 127, %v323_v45  ;;  %s975_s6 = smov (!%p165_p2), 112   ;;  %s976_s7 = smov (!%p165_p2), 16  }
   0x9   : > { %v308_v51 = vld [vmem:[%s1262_s3] ss:$4 sm:$0x3] (!%p165_p2)  ;;  %v874_v59 = vld [vmem:[%s1262_s3 + $0x1] ss:$4 sm:$0x3] (!%p165_p2) }
   0xa   : > { %v1091_v50 = vsub.s32 (!%p165_p2), 0, %v332_v47  ;;  %v1096_v54 = vsub.s32 (!%p165_p2), 1, %v332_v47  ;;  %vm325_vm1 = vcmp.lt.s32.totalorder (!%p165_p2), %v1089_v49, 1  ;;  %vm353_vm2 = vcmp.lt.s32.totalorder (!%p165_p2), %v1089_v49, 127  ;;  %s869_s22 = sshll.u32 (!%p165_p2), %s861_s16, 2 }
   0xb   : > { %378 = vperm.xlu1 (!%p165_p2), %936, %v1024_v4   ;;  %vm513_vm3 = vcmp.lt.s32.totalorder (!%p165_p2), %v1089_v49, 16  ;;  %vm545_vm4 = vcmp.lt.s32.totalorder (!%p165_p2), %v1089_v49, 112  ;;  %p200_p4 = scmp.lt.s32.totalorder (!%p165_p2), %s869_s22, 7 }
   0xc   : > { %219 = vperm.xlu0 (!%p165_p2), %935, %v1024_v4   ;;  %v334_v55 = vrot.slane (!%p165_p2), %v308_v51, %v1091_v50  ;;  %v338_v56 = vrot.slane (!%p165_p2), %v308_v51, %v1096_v54  ;;  %v366_v2 = vrot.slane (!%p165_p2), %v874_v59, %v1096_v54 }
   0xd   : > { %s1265_s17 = smov (!%p193_p3, %s866_s17), 3  ;;  %s1267_s22 = smov (!%p200_p4, %s869_s22), 7 }
   0xe   : > { %s887_s20 = sshll.u32 %s1265_s17, 4  ;;  %s888_s23 = sshll.u32 %s1267_s22, 4 }
   0xf   : > { %s197_s25 = scalar_lea.vmem %s1259_s0, %s887_s20  ;;  %938 = vset.pattern.permute.xlu1 %v964_v11 }
  0x10   : > { %v207_v5 = vld [vmem:[%s197_s25 + $0x8] sm:$0xff]  ;;  %v209_v6 = vld [vmem:[%s197_s25 + $0x18] sm:$0xff]  ;;  %v206_v7 = vld [vmem:[%s197_s25] sm:$0xff]  ;;  %390 = vperm.xlu1 %938, %v1024_v4   ;;  %937 = vset.pattern.permute.xlu0 %v964_v11 }
  0x11   : > { %v889_v8 = vpack.c.bf16 %v209_v6, %v207_v5  ;;  %v208_v9 = vld [vmem:[%s197_s25 + $0x10] sm:$0xff]  ;;  %386 = vperm.xlu0 %937, %v1016_v1  }
  0x12   : > { %v891_v10 = vpack.c.bf16 %v208_v9, %v206_v7 }
  0x13   : > { %890 = vmatprep.subr.bf16.mxu0 %v889_v8 }
  0x14   : > { %892 = vmatpush1.bf16.msra.mxu0 %v891_v10  ;;  %939 = vset.pattern.permute.xlu1 %v965_v12 }
  0x15   : > { %402 = vperm.xlu1 %939, %v1016_v1   ;;  %940 = vset.pattern.permute.xlu0 %v965_v12 }
  0x16   : > { %406 = vperm.xlu0 %940, %v1024_v4  }
  0x17   : > { %872 = vmatmul.mubr.msk.f32.vlgmr.msra.gmra.mrb[0].mxu0 %vm222_vm0, %v1016_v1 }
  0x18   : > { %297 = vmatprep.mubr.f32.mxu0 %v961_v0 }
  0x19   : > { %941 = vset.pattern.permute.xlu1 %v966_v13 }
  0x1a   : > { %462 = vperm.xlu1 %941, %v1016_v1   ;;  %942 = vset.pattern.permute.xlu0 %v967_v14 }
  0x1b   : > { %873 = vmatmul.mubr.msk.f32.gmra.mrb[2].mxu0 %vm222_vm0, %v1024_v4  ;;  %474 = vperm.xlu0 %942, %v1016_v1  }
  0x1c   : > { %673 = vmatprep.mubr.f32.mxu0 %v961_v0 }
  0x1e   : > { %466 = vperm.xlu1 %941, %v1024_v4  }
  0x1f   : > { %945 = vset.pattern.permute.xlu0 %v968_v15 }
  0x20   : > { %494 = vperm.xlu0 %945, %v1024_v4  }
  0x22   : > { %943 = vset.pattern.permute.xlu1 %v967_v14 }
  0x23   : > { %478 = vperm.xlu1 %943, %v1024_v4  }
  0x24   : > { %946 = vset.pattern.permute.xlu0 %v969_v16 }
  0x27   : > { %944 = vset.pattern.permute.xlu1 %v968_v15 }
  0x28   : > { %490 = vperm.xlu1 %944, %v1016_v1  }
  0x2c   : > { %947 = vset.pattern.permute.xlu1 %v969_v16 }
  0x86   : > { %v375_v34 = vpop.permute.xlu1 %374 }
  0x87   : > { %v215_v17 = vpop.permute.xlu0 %214 }
  0x8a   : > { %v1071_v35 = vpop.permute.xlu1 %378 }
  0x8b   : > { %v220_v22 = vpop.permute.xlu0 %219 }
  0x8f   : > { %v1073_v36 = vpop.permute.xlu1 %390 }
  0x90   : > { %v387_v39 = vpop.permute.xlu0 %386 }
  0x94   : > { %v403_v37 = vpop.permute.xlu1 %402 }
  0x95   : > { %v1079_v41 = vpop.permute.xlu0 %406 }
  0x99   : > { %v1075_v38 = vpop.permute.xlu1 %462 }
  0x9a   : > { %v1083_v43 = vpop.permute.xlu0 %474 }
  0x9d   : > { %v1077_v40 = vpop.permute.xlu1 %466 }
  0x9f   : > { %v1087_v46 = vpop.permute.xlu0 %494 }
  0xa2   : > { %v1081_v42 = vpop.permute.xlu1 %478 }
  0xa7   : > { %v1085_v44 = vpop.permute.xlu1 %490 }
  0xea   : > { %v293_v18 = vpop.f32.mrb[0].mxu0 }
  0xeb   : > { %v294_v19 = vadd.f32 %v293_v18, %v215_v17  ;;  %v295_v20 = vpop.f32.mrb[1].mxu0 }
  0xec   : > { %v296_v26 = vadd.f32 %v295_v20, %v215_v17 }
  0xed   : > { %v1047_v21 = vmax.f32 %v294_v19, 0.0 }
  0xee   : > { %v299_v23 = vpop.f32.mrb[2].mxu0  ;;  %v1054_v29 = vmax.f32 %v296_v26, 0.0 }
  0xef   : > { %v300_v24 = vadd.f32 %v299_v23, %v220_v22  ;;  %v301_v25 = vpop.f32.mrb[3].mxu0  ;;  %315 = vrot.lane.b32.xlu1 %v1047_v21, %s970_s26  ;;  %v481_v10 = vmul.f32 %v1083_v43, %v1047_v21  ;;  %v393_v13 = vmul.f32 %v387_v39, %v1047_v21 }
  0xf0   : > { %v302_v28 = vadd.f32 %v301_v25, %v220_v22 }
  0xf1   : > { %v1050_v27 = vmax.f32 %v300_v24, 0.0 }
  0xf2   : > { %v1056_v30 = vmax.f32 %v302_v28, 0.0 }
  0xf3   : > { %317 = vrot.lane.b32.xlu0 %v1050_v27, %s970_s26  ;;  %345 = vrot.lane.b32.xlu1 %v1047_v21, %s971_s27 }
  0xf7   : > { %321 = vrot.lane.b32.xlu0 %v1056_v30, %s970_s26  ;;  %319 = vrot.lane.b32.xlu1 %v1054_v29, %s970_s26  ;;  %s204_s26 = scalar_lea.vmem %s1263_s4, %s888_s23 }
  0xfb   : > { %349 = vrot.lane.b32.xlu0 %v1054_v29, %s971_s27  ;;  %347 = vrot.lane.b32.xlu1 %v1050_v27, %s971_s27 }
  0xff   : > { %418 = vperm.xlu0 %946, %v1016_v1   ;;  %351 = vrot.lane.b32.xlu1 %v1056_v30, %s971_s27 }
 0x103   : > { %949 = vset.pattern.permute.xlu0 %v972_v31  ;;  %422 = vperm.xlu1 %947, %v1024_v4  }
 0x104   : > { %434 = vperm.xlu0 %949, %v1024_v4  }
 0x107   : > { %948 = vset.pattern.permute.xlu1 %v972_v31  ;;  %v395_v31 = vmul.f32 %v1073_v36, %v1050_v27 }
 0x108   : > { %430 = vperm.xlu1 %948, %v1016_v1   ;;  %951 = vset.pattern.permute.xlu0 %v973_v32 }
 0x109   : > { %570 = vperm.xlu0 %951, %v1016_v1  }
 0x10c   : > { %950 = vset.pattern.permute.xlu1 %v974_v33 }
 0x10d   : > { %446 = vperm.xlu1 %950, %v1016_v1   ;;  %v362_v1 = vrot.slane %v874_v59, %v1091_v50 }
 0x111   : > { %450 = vperm.xlu1 %950, %v1024_v4  }
 0x115   : > { %952 = vset.pattern.permute.xlu1 %v973_v32  ;;  %v394_v32 = vmul.f32 %v387_v39, %v1054_v29 }
 0x116   : > { %574 = vperm.xlu1 %952, %v1024_v4  }
 0x161   : > { %v316_v48 = vpop.permute.xlu1 %315 }
 0x165   : > { %v318_v52 = vpop.permute.xlu0 %317  ;;  %v346_v53 = vpop.permute.xlu1 %345 }
 0x169   : > { %v322_v57 = vpop.permute.xlu0 %321  ;;  %v320_v58 = vpop.permute.xlu1 %319 }
 0x16a   : > { %v329_v60 = vsel %vm325_vm1, %v322_v57, %v318_v52  ;;  %v326_v61 = vsel %vm325_vm1, %v316_v48, %v320_v58  ;;  %v328_v62 = vsel %vm325_vm1, %v320_v58, %v316_v48  ;;  %v327_v3 = vsel %vm325_vm1, %v318_v52, %v322_v57 }
 0x16b   : > { %v1104_v63 = vmul.f32 %v334_v55, %v328_v62  ;;  %v1109_v4 = vmul.f32 %v334_v55, %v329_v60  ;;  %v1111_v5 = vmul.f32 %v338_v56, %v326_v61  ;;  %v1123_v14 = vmul.f32 %v338_v56, %v327_v3 }
 0x16c   : > { %v483_v55 = vmul.f32 %v1081_v42, %v1050_v27  ;;  %v396_v57 = vmul.f32 %v1073_v36, %v1056_v30  ;;  %v484_v36 = vmul.f32 %v1081_v42, %v1056_v30 }
 0x16d   : > { %v350_v6 = vpop.permute.xlu0 %349  ;;  %v348_v7 = vpop.permute.xlu1 %347  ;;  %v381_v8 = vmul.f32 %v375_v34, %v1104_v63  ;;  %v469_v9 = vmul.f32 %v1075_v38, %v1104_v63  ;;  %v383_v17 = vmul.f32 %v1071_v35, %v1109_v4  ;;  %v382_v18 = vmul.f32 %v375_v34, %v1111_v5 }
 0x16e   : > { %v354_v11 = vsel %vm353_vm2, %v346_v53, %v350_v6  ;;  %v356_v12 = vsel %vm353_vm2, %v350_v6, %v346_v53  ;;  %v384_v52 = vmul.f32 %v1071_v35, %v1123_v14  ;;  %v471_v53 = vmul.f32 %v1077_v40, %v1109_v4 }
 0x16f   : > { %v1125_v15 = vmul.f32 %v362_v1, %v354_v11  ;;  %v1127_v16 = vmul.f32 %v366_v2, %v356_v12  ;;  %v485_v20 = vadd.f32 %v481_v10, %v469_v9  ;;  %v397_v22 = vadd.f32 %v393_v13, %v381_v8  ;;  %v1194_v10 = vld [vmem:[%s1261_s2 + $0x8] sm:$0xff]  ;;  %v1199_v11 = vld [vmem:[%s1261_s2 + $0x10] sm:$0xff] }
 0x170   : > { %v399_v48 = vadd.f32 %v395_v31, %v383_v17  ;;  %v398_v39 = vadd.f32 %v394_v32, %v382_v18  ;;  %v472_v59 = vmul.f32 %v1077_v40, %v1123_v14  ;;  %v470_v60 = vmul.f32 %v1075_v38, %v1111_v5 }
 0x171   : > { %v352_v19 = vpop.permute.xlu1 %351  ;;  %v497_v25 = vmul.f32 %v1085_v44, %v1125_v15  ;;  %v409_v26 = vmul.f32 %v403_v37, %v1125_v15  ;;  %v410_v47 = vmul.f32 %v403_v37, %v1127_v16  ;;  %v400_v61 = vadd.f32 %v396_v57, %v384_v52 }
 0x172   : > { %v355_v23 = vsel %vm353_vm2, %v348_v7, %v352_v19  ;;  %v357_v24 = vsel %vm353_vm2, %v352_v19, %v348_v7  ;;  %v487_v62 = vadd.f32 %v483_v55, %v471_v53  ;;  %v498_v3 = vmul.f32 %v1085_v44, %v1127_v16  ;;  %v1180_v44 = vld [vmem:[%s1261_s2 + $0x18] sm:$0xff] }
 0x173   : > { %v1139_v28 = vmul.f32 %v362_v1, %v355_v23  ;;  %v1144_v33 = vmul.f32 %v366_v2, %v357_v24  ;;  %v501_v34 = vadd.f32 %v497_v25, %v485_v20  ;;  %v413_v45 = vadd.f32 %v409_v26, %v397_v22 }
 0x174   : > { %v414_v56 = vadd.f32 %v410_v47, %v398_v39  ;;  %v482_v1 = vmul.f32 %v1083_v43, %v1054_v29  ;;  %v488_v6 = vadd.f32 %v484_v36, %v472_v59 }
 0x175   : > { %v411_v51 = vmul.f32 %v1079_v41, %v1139_v28  ;;  %537 = vrot.lane.b32.xlu1 %v501_v34, %s975_s6  ;;  %505 = vrot.lane.b32.xlu0 %v413_v45, %s976_s7  ;;  %v412_v35 = vmul.f32 %v1079_v41, %v1144_v33  ;;  %v499_v58 = vmul.f32 %v1087_v46, %v1139_v28 }
 0x176   : > { %v500_v40 = vmul.f32 %v1087_v46, %v1144_v33  ;;  %v486_v38 = vadd.f32 %v482_v1, %v470_v60  ;;  %v1185_v46 = vld [vmem:[%s1261_s2] sm:$0xff] }
 0x177   : > { %v415_v37 = vadd.f32 %v411_v51, %v399_v48  ;;  %v416_v41 = vadd.f32 %v412_v35, %v400_v61  ;;  %v503_v2 = vadd.f32 %v499_v58, %v487_v62  ;;  %v876_v58 = vld [vmem:[%s1262_s3 + $0x3] ss:$4 sm:$0x3] }
 0x178   : > { %v502_v7 = vadd.f32 %v498_v3, %v486_v38  ;;  %v504_v8 = vadd.f32 %v500_v40, %v488_v6  ;;  %v554_v3 = vrot.slane %v876_v58, %v1091_v50  ;;  %v558_v40 = vrot.slane %v876_v58, %v1096_v54 }
 0x179   : > { %507 = vrot.lane.b32.xlu1 %v415_v37, %s976_s7  ;;  %509 = vrot.lane.b32.xlu0 %v414_v56, %s976_s7 }
 0x17d   : > { %511 = vrot.lane.b32.xlu1 %v416_v41, %s976_s7  ;;  %539 = vrot.lane.b32.xlu0 %v503_v2, %s975_s6 }
 0x17e   : > { %v419_v43 = vpop.permute.xlu0 %418 }
 0x17f   : > { %v425_v18 = vmul.f32 %v419_v43, %v1104_v63  ;;  %v426_v19 = vmul.f32 %v419_v43, %v1111_v5 }
 0x181   : > { %541 = vrot.lane.b32.xlu1 %v502_v7, %s975_s6  ;;  %543 = vrot.lane.b32.xlu0 %v504_v8, %s975_s6 }
 0x182   : > { %v423_v42 = vpop.permute.xlu1 %422 }
 0x183   : > { %v435_v12 = vpop.permute.xlu0 %434  ;;  %v427_v20 = vmul.f32 %v423_v42, %v1109_v4  ;;  %v428_v22 = vmul.f32 %v423_v42, %v1123_v14 }
 0x184   : > { %v439_v23 = vmul.f32 %v435_v12, %v1050_v27  ;;  %v440_v24 = vmul.f32 %v435_v12, %v1056_v30 }
 0x185   : > { %599 = vrot.lane.b32.xlu1 %v1180_v44, %s975_s6  ;;  %593 = vrot.lane.b32.xlu0 %v1185_v46, %s975_s6 }
 0x186   : > { %v443_v48 = vadd.f32 %v439_v23, %v427_v20  ;;  %v444_v5 = vadd.f32 %v440_v24, %v428_v22 }
 0x187   : > { %v431_v9 = vpop.permute.xlu1 %430 }
 0x188   : > { %v437_v13 = vmul.f32 %v431_v9, %v1047_v21  ;;  %v438_v17 = vmul.f32 %v431_v9, %v1054_v29  ;;  %v571_v53 = vpop.permute.xlu0 %570 }
 0x189   : > { %595 = vrot.lane.b32.xlu1 %v1194_v10, %s975_s6  ;;  %597 = vrot.lane.b32.xlu0 %v1199_v11, %s975_s6 }
 0x18a   : > { %v441_v26 = vadd.f32 %v437_v13, %v425_v18  ;;  %v442_v31 = vadd.f32 %v438_v17, %v426_v19 }
 0x18c   : > { %v447_v25 = vpop.permute.xlu1 %446 }
 0x18d   : > { %v453_v32 = vmul.f32 %v447_v25, %v1125_v15  ;;  %v454_v34 = vmul.f32 %v447_v25, %v1127_v16  ;;  %v875_v15 = vld [vmem:[%s1262_s3 + $0x2] ss:$4 sm:$0x3] }
 0x18e   : > { %v522_v56 = vrot.slane %v875_v15, %v1091_v50  ;;  %v526_v57 = vrot.slane %v875_v15, %v1096_v54 }
 0x18f   : > { %v457_v45 = vadd.f32 %v453_v32, %v441_v26  ;;  %v458_v47 = vadd.f32 %v454_v34, %v442_v31 }
 0x190   : > { %v451_v63 = vpop.permute.xlu1 %450 }
 0x191   : > { %v455_v4 = vmul.f32 %v451_v63, %v1139_v28  ;;  %v456_v14 = vmul.f32 %v451_v63, %v1144_v33 }
 0x193   : > { %v459_v51 = vadd.f32 %v455_v4, %v443_v48  ;;  %v460_v52 = vadd.f32 %v456_v14, %v444_v5  ;;  %v897_v5 = vpack.c.bf16 %v1056_v30, %v1054_v29 }
 0x195   : > { %v575_v39 = vpop.permute.xlu1 %574 }
 0x1e7   : > { %v538_v55 = vpop.permute.xlu1 %537  ;;  %v506_v37 = vpop.permute.xlu0 %505 }
 0x1eb   : > { %v508_v16 = vpop.permute.xlu1 %507  ;;  %v510_v28 = vpop.permute.xlu0 %509 }
 0x1ec   : > { %v514_v35 = vsel %vm513_vm3, %v506_v37, %v510_v28  ;;  %v516_v33 = vsel %vm513_vm3, %v510_v28, %v506_v37 }
 0x1ed   : > { %v529_v59 = vmul.f32 %v522_v56, %v516_v33  ;;  %v530_v60 = vmul.f32 %v526_v57, %v514_v35 }
 0x1ef   : > { %v512_v61 = vpop.permute.xlu1 %511  ;;  %v540_v62 = vpop.permute.xlu0 %539  ;;  %v533_v38 = vadd.f32 %v529_v59, %v457_v45  ;;  %v534_v6 = vadd.f32 %v530_v60, %v458_v47 }
 0x1f0   : > { %v515_v1 = vsel %vm513_vm3, %v508_v16, %v512_v61  ;;  %v517_v36 = vsel %vm513_vm3, %v512_v61, %v508_v16 }
 0x1f1   : > { %v531_v41 = vmul.f32 %v522_v56, %v517_v36  ;;  %v532_v2 = vmul.f32 %v526_v57, %v515_v1 }
 0x1f3   : > { %v535_v7 = vadd.f32 %v531_v41, %v459_v51  ;;  %v536_v8 = vadd.f32 %v532_v2, %v460_v52  ;;  %v542_v42 = vpop.permute.xlu1 %541  ;;  %v544_v43 = vpop.permute.xlu0 %543  ;;  %v899_v51 = vpack.c.bf16 %v1050_v27, %v1047_v21 }
 0x1f4   : > { %v546_v9 = vsel %vm545_vm4, %v538_v55, %v542_v42  ;;  %v548_v12 = vsel %vm545_vm4, %v542_v42, %v538_v55  ;;  %v547_v13 = vsel %vm545_vm4, %v540_v62, %v544_v43  ;;  %v549_v17 = vsel %vm545_vm4, %v544_v43, %v540_v62 }
 0x1f5   : > { %v561_v18 = vmul.f32 %v554_v3, %v546_v9  ;;  %v562_v19 = vmul.f32 %v558_v40, %v548_v12  ;;  %v563_v20 = vmul.f32 %v554_v3, %v547_v13  ;;  %v564_v49 = vmul.f32 %v558_v40, %v549_v17 }
 0x1f7   : > { %v565_v22 = vadd.f32 %v561_v18, %v533_v38  ;;  %v566_v23 = vadd.f32 %v562_v19, %v534_v6  ;;  %v567_v24 = vadd.f32 %v563_v20, %v535_v7  ;;  %v568_v50 = vadd.f32 %v564_v49, %v536_v8  ;;  %v600_v4 = vpop.permute.xlu1 %599  ;;  %v594_v14 = vpop.permute.xlu0 %593 }
 0x1f9   : > { %v577_v25 = vadd.f32 %v571_v53, %v565_v22  ;;  %v579_v54 = vadd.f32 %v575_v39, %v567_v24  ;;  %v578_v26 = vadd.f32 %v571_v53, %v566_v23  ;;  %v580_v31 = vadd.f32 %v575_v39, %v568_v50 }
 0x1fb   : > { %v581_v32 = vmax.f32 %v577_v25, 0.0  ;;  %v583_v34 = vmax.f32 %v579_v54, 0.0  ;;  %v582_v45 = vmax.f32 %v578_v26, 0.0  ;;  %v584_v47 = vmax.f32 %v580_v31, 0.0  ;;  %v596_v52 = vpop.permute.xlu1 %595  ;;  %v598_v21 = vpop.permute.xlu0 %597 }
 0x1fd   : > { %v893_v63 = vpack.c.bf16 %v584_v47, %v582_v45  ;;  %v895_v48 = vpack.c.bf16 %v583_v34, %v581_v32 }
 0x1ff   : > { %894 = vmatprep.subr.bf16.mxu0 %v893_v63  ;;  %901 = vmatprep.subr.bf16.mxu1 %v893_v63 }
 0x200   : > { %896 = vmatpush1.bf16.msra.mxu0 %v895_v48  ;;  %902 = vmatpush1.bf16.msra.mxu1 %v895_v48 }
 0x201   : > { %898 = vmatprep.subr.bf16.mxu1 %v897_v5 }
 0x203   : > { %880 = vmatmul.mubr.msk.f32.vlgmr.msra.gmra.mrb[0].mxu1 %vm222_vm0, %v600_v4  ;;  %877 = vmatmul.mubr.msk.f32.vlgmr.msra.gmra.mrb[4].mxu0 %vm222_vm0, %v594_v14 }
 0x204   : > { %900 = vmatpush1.bf16.msra.mxu1 %v899_v51  ;;  %770 = vmatprep.mubr.f32.mxu1 %v961_v0 }
 0x205   : > { %679 = vmatprep.mubr.f32.mxu0 %v961_v0 }
 0x207   : > { %881 = vmatmul.mubr.msk.f32.vlgmr.msra.gmra.mrb[2].mxu1 %vm222_vm0, %v1185_v46  ;;  %878 = vmatmul.mubr.msk.f32.gmra.mrb[6].mxu0 %vm222_vm0, %v596_v52 }
 0x208   : > { %776 = vmatprep.mubr.f32.mxu1 %v961_v0  ;;  %685 = vmatprep.mubr.f32.mxu0 %v961_v0 }
 0x20b   : > { %882 = vmatmul.mubr.msk.f32.gmra.mrb[4].mxu1 %vm222_vm0, %v1194_v10  ;;  %879 = vmatmul.mubr.msk.f32.gmra.mrb[8].mxu0 %vm222_vm0, %v598_v21 }
 0x20c   : > { %782 = vmatprep.mubr.f32.mxu1 %v961_v0 }
 0x20f   : > { %883 = vmatmul.mubr.msk.f32.gmra.mrb[6].mxu1 %vm222_vm0, %v1199_v11 }
 0x210   : > { %788 = vmatprep.mubr.f32.mxu1 %v961_v0 }
 0x213   : > { %884 = vmatmul.mubr.msk.f32.gmra.mrb[0].mxu1 %vm222_vm0, %v1180_v44 }
 0x2d6   : > { %v675_v27 = vpop.f32.mrb[4].mxu0 }
 0x2d7   : > { %v677_v29 = vpop.f32.mrb[5].mxu0 }
 0x2da   : > { %v772_v30 = vpop.f32.mrb[2].mxu1  ;;  %v681_v46 = vpop.f32.mrb[6].mxu0 }
 0x2db   : > { %v773_v10 = vadd.f32 %v772_v30, %v675_v27  ;;  %v774_v11 = vpop.f32.mrb[3].mxu1  ;;  %v683_v53 = vpop.f32.mrb[7].mxu0 }
 0x2dc   : > { %v775_v0 = vadd.f32 %v774_v11, %v677_v29 }
 0x2dd   : > { %795 = vst [vmem:[%s204_s26] sm:$0xff] %v773_v10 }
 0x2de   : > { %796 = vst [vmem:[%s204_s26 + $0x8] sm:$0xff] %v775_v0  ;;  %v778_v44 = vpop.f32.mrb[4].mxu1  ;;  %v687_v39 = vpop.f32.mrb[8].mxu0 }
 0x2df   : > { %v779_v55 = vadd.f32 %v778_v44, %v681_v46  ;;  %v780_v37 = vpop.f32.mrb[5].mxu1  ;;  %v689_v15 = vpop.f32.mrb[9].mxu0 }
 0x2e0   : > { %v781_v16 = vadd.f32 %v780_v37, %v683_v53 }
 0x2e1   : > { %797 = vst [vmem:[%s204_s26 + $0x10] sm:$0xff] %v779_v55 }
 0x2e2   : > { %798 = vst [vmem:[%s204_s26 + $0x18] sm:$0xff] %v781_v16  ;;  %v784_v56 = vpop.f32.mrb[6].mxu1 }
 0x2e3   : > { %v785_v57 = vadd.f32 %v784_v56, %v687_v39  ;;  %v786_v28 = vpop.f32.mrb[7].mxu1 }
 0x2e4   : > { %v787_v35 = vadd.f32 %v786_v28, %v689_v15 }
 0x2e5   : > { %799 = vst [vmem:[%s204_s26 + $0x20] sm:$0xff] %v785_v57 }
 0x2e6   : > { %800 = vst [vmem:[%s204_s26 + $0x28] sm:$0xff] %v787_v35  ;;  %v790_v33 = vpop.f32.mrb[0].mxu1 }
 0x2e7   : > { %801 = vst [vmem:[%s204_s26 + $0x30] sm:$0xff] %v790_v33  ;;  %v792_v58 = vpop.f32.mrb[1].mxu1 }
 0x2e8   : > { %802 = vst [vmem:[%s204_s26 + $0x38] sm:$0xff] %v792_v58 }
 0x2e9 PF: > { %s14_s15 = sadd.s32 1, %s959_s15  }
 0x2ea   : > { %p11_p5 = scmp.ge.s32.totalorder %s14_s15, 4  }
 0x2ec   :  { %13 = sbr.rel (!%p11_p5) target bundleno = 1 (0x1), region = 69 }

</bundles_post_ra>
